<compile_context>
chip_gen: v7x
topology: tpu7x:2x2x1
jax: 0.10.0
libtpu: 0.0.40
codegen_flags: <defaults>
</compile_context>

<pallas_src>
import jax
import jax.numpy as jnp
from jax.experimental import pallas as pl
from jax.experimental.pallas import tpu as pltpu


def _cdiv(a: int, b: int) -> int:
    return (a + b - 1) // b


def _round_up(x: int, m: int) -> int:
    return _cdiv(x, m) * m


_SUBLANE = {4: 8, 2: 16, 1: 32}  # min sublane multiple per itemsize


def _physical_vmem_bytes() -> int:
    """Best-effort physical VMEM size; conservative fallback = v7x per-core."""
    try:
        info = pltpu.get_tpu_info()
        v = getattr(info, "vmem_capacity_bytes", None)
        if v:
            return int(v)
    except Exception:
        pass
    return 64 * 1024 * 1024


def _zero_dkz_kernel(phos_ref, weff_ref, bias_ref, out_ref):
    # phos_ref: [TM, Dp]  weff_ref: [Dp, TN]  bias_ref: [1, TN]  out_ref: [TM, TN]
    acc = jnp.dot(
        phos_ref[...], weff_ref[...], preferred_element_type=jnp.float32
    )  # MXU
    out_ref[...] = (acc + bias_ref[...]).astype(out_ref.dtype)  # bias add on VPU


def _select_tiles(P, Dp, K_pad0, sublane, isz_in, isz_out, budget, tm_max, tn_max):
    tm_max = max(sublane, tm_max - tm_max % sublane)
    tn_max = max(128, tn_max - tn_max % 128)

    # ---- TN: one K-tile if it fits, else the 128-multiple minimizing K padding.
    if K_pad0 <= tn_max:
        TN = K_pad0
    else:
        best = None
        for tn in range(tn_max, 127, -128):
            waste = _round_up(K_pad0, tn) - K_pad0
            key = (waste, -tn)  # least padding, then largest tile
            if best is None or key < best[0]:
                best = (key, tn)
        TN = best[1]

    def vmem_bytes(tm, tn):
        # double-buffered: phos tile + W_eff tile + bias tile + output tile
        return 2 * (tm * Dp * isz_in + Dp * tn * isz_in + tn * 4 + tm * tn * isz_out)

    # ---- TM: aim for >= 4 row-tiles (megacore sharding on v7x + pipelining),
    #      but don't pad tiny P past one sublane group.
    tm_target = _round_up(max(_cdiv(P, 4), 1), sublane)
    TM = max(sublane, min(tm_max, tm_target))

    # ---- shrink until the double-buffered working set fits the VMEM budget.
    while vmem_bytes(TM, TN) > budget:
        if TM > sublane:
            TM = max(sublane, _round_up(TM // 2, sublane))
        elif TN > 128:
            TN = max(128, _round_up(TN // 2, 128))
        else:
            # TODO(synk): for extremely wide Dp add an 'arbitrary' Dp-reduction
            # grid axis with an f32 accumulator scratch (standard P3 pattern).
            break
    return TM, TN, vmem_bytes(TM, TN)


def zero_dkz_forward(W, phosphosites, unseen_kinases, *,
                     tm_max=1024, tn_max=1024, matmul_dtype=None):
    """JAX/Pallas equivalent of Zero_DKZ.forward with all sub-models = None."""
    # TODO(synk): phosphosite_model / kinase_model / sequence_model are None in
    # this config (identity); a non-None sub-model would be a separate network.
    phos = phosphosites
    kin_seq = unseen_kinases["sequences"]
    kin_prop = unseen_kinases["properties"]

    # Mirrors `if len(properties.size()) > 0: cat along feature dim`.
    if kin_prop is not None and kin_prop.ndim > 0 and kin_prop.size > 0:
        kin_seq = jnp.concatenate([kin_seq, kin_prop], axis=1)

    P, Dp = phos.shape
    K, Dk = kin_seq.shape
    assert W.shape == (Dp + 1, Dk + 1), f"W shape {W.shape} != {(Dp + 1, Dk + 1)}"

    out_dtype = phos.dtype
    cmp_dtype = jnp.dtype(matmul_dtype) if matmul_dtype is not None else jnp.dtype(out_dtype)

    # ---- tiny reassociated reduction, done once (cheap vs the P-sized matmul) --
    #   W_eff = W @ kin_pad.T == W[:, :Dk] @ kin.T + W[:, Dk:Dk+1]   -> [Dp+1, K]
    W_eff = (
        jnp.dot(W[:, :Dk], kin_seq.T, preferred_element_type=jnp.float32)
        + W[:, Dk:Dk + 1]
    )

    # ---- tiling ----------------------------------------------------------------
    isz_in = cmp_dtype.itemsize
    isz_out = jnp.dtype(out_dtype).itemsize
    sublane = max(_SUBLANE.get(isz_in, 8), _SUBLANE.get(isz_out, 8))

    phys = _physical_vmem_bytes()
    budget = min(int(0.75 * phys), 100 * 1024 * 1024)

    K_pad0 = _round_up(K, 128)  # lane-dense output -> unmasked vst
    TM, TN, needed = _select_tiles(
        P, Dp, K_pad0, sublane, isz_in, isz_out, budget, tm_max, tn_max
    )
    K_pad = _round_up(K_pad0, TN)

    grid_i = _cdiv(P, TM)   # ragged last row-tile: NO padded copy of phos in HBM
    grid_j = K_pad // TN

    # Only the tiny W_eff / bias get K-padded; the big phos stream is untouched.
    Wm = jnp.pad(W_eff[:Dp, :], ((0, 0), (0, K_pad - K))).astype(cmp_dtype)  # [Dp, K_pad]
    bias = jnp.pad(W_eff[Dp:Dp + 1, :], ((0, 0), (0, K_pad - K)))            # [1, K_pad] f32
    phos_in = phos if cmp_dtype == phos.dtype else phos.astype(cmp_dtype)

    cost = pl.CostEstimate(
        flops=2 * P * Dp * K_pad + P * K_pad,
        transcendentals=0,
        bytes_accessed=(
            phos_in.size * isz_in + Wm.size * isz_in + bias.size * 4
            + P * K_pad * isz_out
        ),
    )

    if grid_j == 1:
        # Common zero-shot case: 1-D sweep over row tiles. W_eff / bias block
        # indices never change -> fetched once, resident in VMEM for the grid.
        grid = (grid_i,)
        in_specs = [
            pl.BlockSpec((TM, Dp), lambda i: (i, 0)),
            pl.BlockSpec((Dp, TN), lambda i: (0, 0)),
            pl.BlockSpec((1, TN), lambda i: (0, 0)),
        ]
        out_specs = pl.BlockSpec((TM, TN), lambda i: (i, 0))
        dims = ("parallel",)
    else:
        grid = (grid_i, grid_j)
        in_specs = [
            pl.BlockSpec((TM, Dp), lambda i, j: (i, 0)),
            pl.BlockSpec((Dp, TN), lambda i, j: (0, j)),
            pl.BlockSpec((1, TN), lambda i, j: (0, j)),
        ]
        out_specs = pl.BlockSpec((TM, TN), lambda i, j: (i, j))
        dims = ("parallel", "parallel")

    vmem_limit = min(phys, max(budget, needed + (4 << 20)))

    out = pl.pallas_call(
        _zero_dkz_kernel,
        out_shape=jax.ShapeDtypeStruct((P, K_pad), out_dtype),
        grid_spec=pltpu.PrefetchScalarGridSpec(
            num_scalar_prefetch=0,
            grid=grid,
            in_specs=in_specs,
            out_specs=out_specs,
        ),
        compiler_params=pltpu.CompilerParams(
            dimension_semantics=dims,
            vmem_limit_bytes=vmem_limit,
        ),
        cost_estimate=cost,
    )(phos_in, Wm, bias)

    # Row count is exact (no row padding); only the K lane padding is sliced off.
    # TODO(synk): consumers able to handle the lane-padded [P, K_pad] buffer can
    # take `out` directly and skip this extra output-sized pass.
    return {"unique_logits": out[:, :K]}


def zero_dkz_reference(W, phosphosites, unseen_kinases):
    """Pure-JAX reference mirroring the PyTorch math exactly."""
    phos = phosphosites
    kin_seq = unseen_kinases["sequences"]
    kin_prop = unseen_kinases["properties"]
    if kin_prop is not None and kin_prop.ndim > 0 and kin_prop.size > 0:
        kin_seq = jnp.concatenate([kin_seq, kin_prop], axis=1)
    phos_pad = jnp.pad(phos, ((0, 0), (0, 1)), constant_values=1.0)
    kin_pad = jnp.pad(kin_seq, ((0, 0), (0, 1)), constant_values=1.0)
    compatibility = phos_pad @ W
    return {"unique_logits": compatibility @ kin_pad.T}


def _check(W, phos, kin, **kw):
    out = zero_dkz_forward(W, phos, kin, **kw)
    logits = jax.block_until_ready(out["unique_logits"])
    ref = zero_dkz_reference(W, phos, kin)["unique_logits"]
    assert logits.shape == ref.shape, (logits.shape, ref.shape)
    err = float(jnp.max(jnp.abs(logits - ref)))
    assert jnp.allclose(logits, ref, atol=1e-4, rtol=1e-4), err
    return logits


if __name__ == "__main__":
    key = jax.random.PRNGKey(0)
    k_w, k_p, k_s, k_pr, k_w2, k_p2, k_s2, k_pr2 = jax.random.split(key, 8)

    # ---- primary small, module-consistent shapes ------------------------------
    P, Dp, K, Ds, Dprop = 8, 32, 8, 24, 7
    Dk = Ds + Dprop
    # W: torch.rand(w_dim[0], w_dim[1]) * 0.05  with w_dim = (Dp+1, Dk+1)
    W = jax.random.uniform(k_w, (Dp + 1, Dk + 1), dtype=jnp.float32) * 0.05
    phosphosites = jax.random.normal(k_p, (P, Dp), dtype=jnp.float32)
    unseen_kinases = {
        "sequences": jax.random.normal(k_s, (K, Ds), dtype=jnp.float32),
        "properties": jax.random.normal(k_pr, (K, Dprop), dtype=jnp.float32),
    }
    _check(W, phosphosites, unseen_kinases)  # 1-D grid, single row tile

    # ---- exercise ragged row tiles + multi-step 1-D grid and the 2-D grid path --
    P2, Dp2, K2, Ds2, Dprop2 = 20, 48, 200, 150, 49
    Dk2 = Ds2 + Dprop2
    W2 = jax.random.uniform(k_w2, (Dp2 + 1, Dk2 + 1), dtype=jnp.float32) * 0.05
    phos2 = jax.random.normal(k_p2, (P2, Dp2), dtype=jnp.float32)
    kin2 = {
        "sequences": jax.random.normal(k_s2, (K2, Ds2), dtype=jnp.float32),
        "properties": jax.random.normal(k_pr2, (K2, Dprop2), dtype=jnp.float32),
    }
    _check(W2, phos2, kin2)                 # ragged last row-tile, TN = K_pad, 1-D grid
    _check(W2, phos2, kin2, tn_max=128)     # forces the 2-D (i, j) grid path

    print("KERNEL_OK")
</pallas_src>

<mosaic_0001>
module attributes {stable_mosaic.version = 11 : i64} {
  func.func @_zero_dkz_kernel(%arg0: i32, %arg1: memref<8x32xf32, #tpu.memory_space<vmem>>, %arg2: memref<32x128xf32, #tpu.memory_space<vmem>>, %arg3: memref<1x128xf32, #tpu.memory_space<vmem>>, %arg4: memref<8x128xf32, #tpu.memory_space<vmem>>) attributes {dimension_semantics = [#tpu.dimension_semantics<parallel>], iteration_bounds = array<i64: 1>, scalar_prefetch = 0 : i64, scratch_operands = 0 : i64, tpu.core_type = #tpu.core_type<tc>, window_params = [{transform_indices = @transform_0, window_bounds = array<i64: 8, 32>}, {pipeline_mode = #tpu.pipeline_mode<synchronous>, transform_indices = @transform_1, window_bounds = array<i64: 32, 128>}, {pipeline_mode = #tpu.pipeline_mode<synchronous>, transform_indices = @transform_2, window_bounds = array<i64: 1, 128>}, {transform_indices = @transform_3, window_bounds = array<i64: 8, 128>}]} {
    %c0 = arith.constant 0 : index
    %c0_0 = arith.constant 0 : index
    %0 = vector.load %arg1[%c0, %c0_0] : memref<8x32xf32, #tpu.memory_space<vmem>>, vector<8x32xf32>
    %c0_1 = arith.constant 0 : index
    %c0_2 = arith.constant 0 : index
    %1 = vector.load %arg2[%c0_1, %c0_2] : memref<32x128xf32, #tpu.memory_space<vmem>>, vector<32x128xf32>
    %cst = arith.constant dense<0.000000e+00> : vector<8x128xf32>
    %2 = tpu.matmul %0, %1, %cst {dimension_numbers = #tpu.dot_dimension_numbers<[1], [0], [0], [1], [0, 0, 1, 1], [], []>} : vector<8x32xf32>, vector<32x128xf32>, vector<8x128xf32> -> vector<8x128xf32>
    %c0_3 = arith.constant 0 : index
    %c0_4 = arith.constant 0 : index
    %3 = vector.load %arg3[%c0_3, %c0_4] : memref<1x128xf32, #tpu.memory_space<vmem>>, vector<1x128xf32>
    %4 = vector.broadcast %3 : vector<1x128xf32> to vector<8x128xf32>
    %5 = arith.addf %2, %4 : vector<8x128xf32>
    %c0_5 = arith.constant 0 : index
    %c0_6 = arith.constant 0 : index
    %6 = vector.load %arg4[%c0_5, %c0_6] : memref<8x128xf32, #tpu.memory_space<vmem>>, vector<8x128xf32>
    tpu.vector_store %arg4[%c0_5, %c0_6], %5 {strides = array<i32>} : memref<8x128xf32, #tpu.memory_space<vmem>>, vector<8x128xf32>,
    return
  }
  func.func @transform_0(%arg0: i32) -> (i32, i32) {
    %c0_i32 = arith.constant 0 : i32
    %c0_i32_0 = arith.constant 0 : i32
    return %arg0, %c0_i32 : i32, i32
  }
  func.func @transform_1(%arg0: i32) -> (i32, i32) {
    %c0_i32 = arith.constant 0 : i32
    %c0_i32_0 = arith.constant 0 : i32
    %c0_i32_1 = arith.constant 0 : i32
    return %c0_i32, %c0_i32_0 : i32, i32
  }
  func.func @transform_2(%arg0: i32) -> (i32, i32) {
    %c0_i32 = arith.constant 0 : i32
    %c0_i32_0 = arith.constant 0 : i32
    %c0_i32_1 = arith.constant 0 : i32
    return %c0_i32, %c0_i32_0 : i32, i32
  }
  func.func @transform_3(%arg0: i32) -> (i32, i32) {
    %c0_i32 = arith.constant 0 : i32
    %c0_i32_0 = arith.constant 0 : i32
    return %arg0, %c0_i32 : i32, i32
  }
}

</mosaic_0001>

<bundles_post_ra>
// kernel: tpu_custom_call.1
= control target key start
LH: loop header
LB: loop body
LE: loop exit
PB: predicated region body
PF: predicated region fallthrough
CT: control target
= control target key end

     0   :  { %8 = vsyncpa [#allocation3], 0  ;;  %s322_s0 = inlined_call_operand.hbm [shape: f32[8,32], index: 0, kind: input, shape index: {}]   ;;  %s323_s1 = inlined_call_operand.hbm [shape: f32[32,128], index: 1, kind: input, shape index: {}]   ;;  %s324_s2 = inlined_call_operand.vmem [shape: f32[1,128], index: 2, kind: input, shape index: {}]   ;;  %s325_s3 = inlined_call_operand.hbm [shape: f32[8,128], index: 3, kind: output, shape index: {}]  }
   0x1   :  { %9 = vsyncpa [#allocation6], 0 }
   0x2   :  { %10 = vsyncpa [#allocation4], 0  ;;  %s248_s12 = smov [#allocation2]   ;;  %s249_s14 = smov [#allocation5]  }
   0x3   :  { %s17_s13 = sshll.u32 %s248_s12, 4  ;;  %s26_s15 = sshll.u32 %s249_s14, 4  ;;  %s18_s13 = int_to_ptr.vmem [resolvable:$true] %s17_s13  ;;  %s276_s15 = int_to_ptr.vmem [resolvable:$true] %s26_s15 }
   0x4   :  { %s176_s18 = scalar_lea.hbm %s322_s0, 128 }
   0x5   :  { %p177_p0 = scmp.ne.s32.totalorder %s322_s0, %s176_s18  ;;  %p180_p1 = scmp.lt.u32.totalorder %s176_s18, %s322_s0 }
   0x7   :  { %p182_p2 = pnand %p180_p1, %p177_p0 }
   0x9   :  { %185 = shalt.err (!%p182_p2)
}
   0xa   :  { %s186_s23 = scalar_lea.vmem %s18_s13, 128  ;;  %p191_p4 = scmp.lt.s32.totalorder %s18_s13, %s18_s13 }
   0xb   :  { %p187_p3 = scmp.ne.s32.totalorder %s18_s13, %s186_s23  ;;  %p192_p5 = scmp.lt.s32.totalorder %s186_s23, %s186_s23 }
   0xd   :  { %p193_p6 = por %p192_p5, %p191_p4 }
   0xf   :  { %p194_p7 = pnand %p193_p6, %p187_p3 }
  0x11   :  { %197 = shalt.err (!%p194_p7)
}
  0x12   :  { %20 = dma.hbm_to_vmem [thread:$0]  %s322_s0, 128, %s18_s13, [#allocation3]  }
  0x13   :  { %s198_s28 = scalar_lea.hbm %s323_s1, 512 }
  0x14   :  { %p199_p8 = scmp.ne.s32.totalorder %s323_s1, %s198_s28  ;;  %p202_p9 = scmp.lt.u32.totalorder %s198_s28, %s323_s1 }
  0x16   :  { %p204_p10 = pnand %p202_p9, %p199_p8 }
  0x18   :  { %207 = shalt.err (!%p204_p10)
}
  0x19   :  { %s208_s6 = scalar_lea.vmem %s276_s15, 512  ;;  %p213_p12 = scmp.lt.s32.totalorder %s276_s15, %s276_s15 }
  0x1a   :  { %p209_p11 = scmp.ne.s32.totalorder %s276_s15, %s208_s6  ;;  %p214_p13 = scmp.lt.s32.totalorder %s208_s6, %s208_s6 }
  0x1c   :  { %p215_p0 = por %p214_p13, %p213_p12 }
  0x1e   :  { %p216_p1 = pnand %p215_p0, %p209_p11 }
  0x20   :  { %219 = shalt.err (!%p216_p1)
}
  0x21   :  { %s250_s0 = smov 128   ;;  %s251_s7 = smov 8  }
  0x22   :  { %32 = dma.hbm_to_vmem [thread:$0]  %s323_s1, 512, %s276_s15, [#allocation6], %s250_s0, %s250_s0, %s251_s7  }
  0x23   :  { %242 = dma.done.wait [#allocation3], 128  }
  0x24   :  { %243 = vsyncadd [#allocation3], 4294967168 }
  0x25   :  { %244 = dma.done.wait [#allocation6], 512  }
  0x26   :  { %245 = vsyncadd [#allocation6], 4294966784  ;;  %v252_v0 = vmov 0.0|0.0   ;;  %vm253_vm0 = vmmov 0   ;;  %v254_v1 = vmov 0.0   ;;  %v42_v2 = vld [vmem:[#allocation5] sm:$0xff] }
  0x27   :  { %162 = vmatprep.subr.bf16.mxu0 %v252_v0  ;;  %159 = vmatprep.mubr.msk.f32.mxu0 %vm253_vm0, %v254_v1  ;;  %v43_v3 = vld [vmem:[#allocation5 + $0x8] sm:$0xff]  ;;  %v44_v4 = vld [vmem:[#allocation5 + $0x10] sm:$0xff]  ;;  %v45_v6 = vld [vmem:[#allocation5 + $0x18] sm:$0xff]  ;;  %vm53_vm1 = vcmask 261120   ;;  %s255_s11 = smov [#allocation7]  }
  0x28   :  { %v163_v5 = vpack.c.bf16 %v43_v3, %v42_v2  ;;  %v166_v7 = vpack.c.bf16 %v45_v6, %v44_v4  ;;  %v41_v8 = vld [vmem:[#allocation2] sm:$0xff]  ;;  %s134_s12 = sshll.u32 %s255_s11, 4  ;;  %s135_s12 = int_to_ptr.vmem [resolvable:$true] %s134_s12 }
  0x29   :  { %v144_v9 = vld [vmem:[%s324_s2] ss:$0 sm:$0xff]  ;;  %s220_s13 = scalar_lea.vmem %s135_s12, 128  ;;  %p225_p3 = scmp.lt.s32.totalorder %s135_s12, %s135_s12 }
  0x2a   :  { %164 = vmatpush3.bf16.msra.mxu0 %v163_v5  ;;  %p221_p2 = scmp.ne.s32.totalorder %s135_s12, %s220_s13  ;;  %p226_p4 = scmp.lt.s32.totalorder %s220_s13, %s220_s13 }
  0x2b   :  { %165 = vmatprep.subr.bf16.mxu0 %v252_v0 }
  0x2c   :  { %p227_p5 = por %p226_p4, %p225_p3 }
  0x2e   :  { %167 = vmatpush3.bf16.msra.mxu0 %v166_v7  ;;  %p228_p6 = pnand %p227_p5, %p221_p2 }
  0x31   :  { %160 = vmatmul.mubr.msk.f32.vlgmr.msra.gmra.mrb[0].mxu0 %vm53_vm1, %v41_v8 }
 0x104   :  { %v123_v10 = vpop.f32.mrb[0].mxu0 }
 0x105   :  { %v124_v11 = vadd.f32 %v144_v9, %v123_v10  ;;  %v161_v12 = vpop.f32.mrb[1].mxu0 }
 0x107   :  { %127 = vst [vmem:[#allocation7] sm:$0xff] %v124_v11 }
 0x108   :  { %231 = shalt.err (!%p228_p6)
}
 0x109   :  { %s232_s16 = scalar_lea.hbm %s325_s3, 128 }
 0x10a   :  { %p233_p7 = scmp.ne.s32.totalorder %s325_s3, %s232_s16  ;;  %p236_p8 = scmp.lt.u32.totalorder %s232_s16, %s325_s3 }
 0x10c   :  { %p238_p9 = pnand %p236_p8, %p233_p7 }
 0x10e   :  { %241 = shalt.err (!%p238_p9)
}
 0x10f   :  { %137 = dma.vmem_to_hbm [thread:$0]  %s135_s12, 128, %s325_s3, [#allocation4]  }
 0x110   :  { %246 = dma.done.wait [#allocation4], 128  }
 0x111   :  { %247 = vsyncadd [#allocation4], 4294967168 }
 0x112   :  { %141 = vsyncpa [#allocation3], 1 }
 0x113   :  { %142 = vsyncpa [#allocation6], 1 }
 0x114   :  { %143 = vsyncpa [#allocation4], 1 }

</bundles_post_ra>
